<compile_context>
chip_gen: v5e
topology: v5e:2x2
jax: 0.10.0
libtpu: 0.0.40
codegen_flags: <defaults>
</compile_context>

<pallas_src>
import functools

import jax
import jax.numpy as jnp
from jax.experimental import pallas as pl
from jax.experimental.pallas import tpu as pltpu

INPUT_DIM = 784
HIDDEN_DIM = 200
OUTPUT_DIM = 10

# Lane-padded (multiples of 128) internal dims; K of layer-1 stays 784 (full dim).
HID_P = 256   # 2 * 128
OUT_P = 128   # 1 * 128


def _round_up(x, m):
    return (x + m - 1) // m * m


def _cdiv(a, b):
    return (a + b - 1) // b


def ann_kernel(x_ref, w1_ref, b1_ref, w2_ref, b2_ref, w3_ref, b3_ref, o_ref):
    # In-kernel f32 -> bf16 cast of the streamed x tile (VPU work hidden under MXU).
    x = x_ref[...].astype(jnp.bfloat16)                               # (TB, 784)
    h1 = jnp.dot(x, w1_ref[...], preferred_element_type=jnp.float32)  # (TB, HID_P)
    h1 = jnp.maximum(h1 + b1_ref[...], 0.0)
    h2 = jnp.dot(h1.astype(jnp.bfloat16), w2_ref[...],
                 preferred_element_type=jnp.float32)                  # (TB, HID_P)
    h2 = jnp.maximum(h2 + b2_ref[...], 0.0)
    out = jnp.dot(h2.astype(jnp.bfloat16), w3_ref[...],
                  preferred_element_type=jnp.float32) + b3_ref[...]   # (TB, OUT_P)
    o_ref[...] = out.astype(o_ref.dtype)                              # bf16, lane-dense


def prepare_params(w1, b1, w2, b2, w3, b3):
    """Pad + cast the parameters ONCE (hoisted out of the per-call forward).

    Weights -> bf16, zero-padded along output (and hidden) dims to 128-lane
    multiples; biases -> f32, zero-padded the same way. Zero padding is
    mathematically neutral and the padded logits lanes are sliced off later.
    """
    w1p = jnp.pad(w1.astype(jnp.bfloat16), ((0, 0), (0, HID_P - HIDDEN_DIM)))
    b1p = jnp.pad(b1.astype(jnp.float32), ((0, 0), (0, HID_P - HIDDEN_DIM)))
    w2p = jnp.pad(w2.astype(jnp.bfloat16),
                  ((0, HID_P - HIDDEN_DIM), (0, HID_P - HIDDEN_DIM)))
    b2p = jnp.pad(b2.astype(jnp.float32), ((0, 0), (0, HID_P - HIDDEN_DIM)))
    w3p = jnp.pad(w3.astype(jnp.bfloat16),
                  ((0, HID_P - HIDDEN_DIM), (0, OUT_P - OUTPUT_DIM)))
    b3p = jnp.pad(b3.astype(jnp.float32), ((0, 0), (0, OUT_P - OUTPUT_DIM)))
    return w1p, b1p, w2p, b2p, w3p, b3p


def _choose_tiling(batch, tile_b):
    batch8 = _round_up(batch, 8)
    tile_b = max(8, min(tile_b, batch8))
    tile_b = (tile_b // 8) * 8
    num_tiles = _cdiv(batch8, tile_b)
    # v7x has 2 TensorCores: keep the "parallel" grid axis >= 2 for large batches.
    if num_tiles == 1 and batch8 >= 512:
        num_tiles = 2
    # Re-balance so batch padding is < one tile's worth of rows (avoids the
    # batch=300 / tile=256 -> 512-row blow-up).
    tile_b = _round_up(_cdiv(batch8, num_tiles), 8)
    batch_p = tile_b * num_tiles
    return tile_b, batch_p, num_tiles


@functools.partial(jax.jit, static_argnames=("tile_b",))
def ann_forward(x, w1p, b1p, w2p, b2p, w3p, b3p, tile_b=1024):
    """Forward pass. Params must already be padded/cast via prepare_params()."""
    batch = x.shape[0]
    tile_b, batch_p, num_tiles = _choose_tiling(batch, tile_b)
    grid = (num_tiles,)

    # Only the batch dim is padded; x stays f32 and 784-wide (cast in-kernel).
    xp = jnp.pad(x, ((0, batch_p - batch), (0, 0)))

    flops = 2 * batch_p * (INPUT_DIM * HID_P + HID_P * HID_P + HID_P * OUT_P)
    bytes_accessed = (
        xp.size * 4                                     # f32 x read
        + (w1p.size + w2p.size + w3p.size) * 2          # bf16 weights
        + (b1p.size + b2p.size + b3p.size) * 4          # f32 biases
        + batch_p * OUT_P * 2                           # bf16 logits write
    )

    out = pl.pallas_call(
        ann_kernel,
        out_shape=jax.ShapeDtypeStruct((batch_p, OUT_P), jnp.bfloat16),
        grid=grid,
        in_specs=[
            # x tile streams per grid step (software-pipelined DMA).
            pl.BlockSpec((tile_b, INPUT_DIM), lambda i: (i, 0)),
            # Weights / biases stay VMEM-resident (constant index maps).
            pl.BlockSpec((INPUT_DIM, HID_P), lambda i: (0, 0)),
            pl.BlockSpec((1, HID_P), lambda i: (0, 0)),
            pl.BlockSpec((HID_P, HID_P), lambda i: (0, 0)),
            pl.BlockSpec((1, HID_P), lambda i: (0, 0)),
            pl.BlockSpec((HID_P, OUT_P), lambda i: (0, 0)),
            pl.BlockSpec((1, OUT_P), lambda i: (0, 0)),
        ],
        out_specs=pl.BlockSpec((tile_b, OUT_P), lambda i: (i, 0)),
        compiler_params=pltpu.CompilerParams(
            dimension_semantics=("parallel",),   # shard batch across v7x TCs
            vmem_limit_bytes=32 << 20,           # fits 1024-row f32 tiles + weights
        ),
        cost_estimate=pl.CostEstimate(
            flops=flops, transcendentals=0, bytes_accessed=bytes_accessed),
    )(xp, w1p, b1p, w2p, b2p, w3p, b3p)

    # Slice away batch / lane padding; return f32 logits like the PyTorch module.
    return out[:batch, :OUTPUT_DIM].astype(jnp.float32)


def init_params(key):
    # Deterministic synthetic init (uniform, roughly matching nn.Linear scale).
    # Weights stored as (in_dim, out_dim) == transpose of PyTorch's (out, in).
    ks = jax.random.split(key, 6)

    def linear(kw, kb, fan_in, fan_out):
        bound = 1.0 / jnp.sqrt(fan_in)
        w = jax.random.uniform(kw, (fan_in, fan_out), jnp.float32, -bound, bound)
        b = jax.random.uniform(kb, (1, fan_out), jnp.float32, -bound, bound)
        return w, b

    w1, b1 = linear(ks[0], ks[1], INPUT_DIM, HIDDEN_DIM)
    w2, b2 = linear(ks[2], ks[3], HIDDEN_DIM, HIDDEN_DIM)
    w3, b3 = linear(ks[4], ks[5], HIDDEN_DIM, OUTPUT_DIM)
    return w1, b1, w2, b2, w3, b3


def reference_forward_f32(x, w1, b1, w2, b2, w3, b3):
    h1 = jnp.maximum(x @ w1 + b1, 0.0)
    h2 = jnp.maximum(h1 @ w2 + b2, 0.0)
    return h2 @ w3 + b3


def reference_forward_bf16(x, w1, b1, w2, b2, w3, b3):
    # Mirrors the kernel's bf16-operand / f32-accumulate / bf16-output numerics.
    d = lambda a, b: jnp.dot(a.astype(jnp.bfloat16), b.astype(jnp.bfloat16),
                             preferred_element_type=jnp.float32)
    h1 = jnp.maximum(d(x, w1) + b1, 0.0)
    h2 = jnp.maximum(d(h1, w2) + b2, 0.0)
    out = d(h2, w3) + b3
    return out.astype(jnp.bfloat16).astype(jnp.float32)


if __name__ == "__main__":
    key = jax.random.PRNGKey(0)
    kx, kp = jax.random.split(key)
    batch = 8
    x = jax.random.normal(kx, (batch, INPUT_DIM), jnp.float32)
    params = init_params(kp)

    # Pad / cast the params once (not per-call).
    padded = prepare_params(*params)

    out = ann_forward(x, *padded)
    out = jax.block_until_ready(out)
    assert out.shape == (batch, OUTPUT_DIM)

    # Tight check against a reference with identical bf16/f32-acc numerics.
    ref_bf16 = reference_forward_bf16(x, *params)
    assert jnp.allclose(out, ref_bf16, atol=2e-2, rtol=2e-2)

    # Loose check against the pure-f32 PyTorch-equivalent forward
    # (bf16 operands / bf16 logits -> ~1e-2 relative error expected).
    ref_f32 = reference_forward_f32(x, *params)
    assert jnp.allclose(out, ref_f32, atol=5e-2, rtol=5e-2)

    print("KERNEL_OK")
</pallas_src>

<mosaic_0001>
module attributes {stable_mosaic.version = 11 : i64} {
  func.func @ann_kernel(%arg0: i32, %arg1: memref<8x784xf32, #tpu.memory_space<vmem>>, %arg2: memref<784x256xbf16, #tpu.memory_space<vmem>>, %arg3: memref<1x256xf32, #tpu.memory_space<vmem>>, %arg4: memref<256x256xbf16, #tpu.memory_space<vmem>>, %arg5: memref<1x256xf32, #tpu.memory_space<vmem>>, %arg6: memref<256x128xbf16, #tpu.memory_space<vmem>>, %arg7: memref<1x128xf32, #tpu.memory_space<vmem>>, %arg8: memref<8x128xbf16, #tpu.memory_space<vmem>>) attributes {dimension_semantics = [#tpu.dimension_semantics<parallel>], iteration_bounds = array<i64: 1>, scalar_prefetch = 0 : i64, scratch_operands = 0 : i64, tpu.core_type = #tpu.core_type<tc>, window_params = [{transform_indices = @transform_0, window_bounds = array<i64: 8, 784>}, {pipeline_mode = #tpu.pipeline_mode<synchronous>, transform_indices = @transform_1, window_bounds = array<i64: 784, 256>}, {pipeline_mode = #tpu.pipeline_mode<synchronous>, transform_indices = @transform_2, window_bounds = array<i64: 1, 256>}, {pipeline_mode = #tpu.pipeline_mode<synchronous>, transform_indices = @transform_3, window_bounds = array<i64: 256, 256>}, {pipeline_mode = #tpu.pipeline_mode<synchronous>, transform_indices = @transform_4, window_bounds = array<i64: 1, 256>}, {pipeline_mode = #tpu.pipeline_mode<synchronous>, transform_indices = @transform_5, window_bounds = array<i64: 256, 128>}, {pipeline_mode = #tpu.pipeline_mode<synchronous>, transform_indices = @transform_6, window_bounds = array<i64: 1, 128>}, {transform_indices = @transform_7, window_bounds = array<i64: 8, 128>}]} {
    %c0 = arith.constant 0 : index
    %c0_0 = arith.constant 0 : index
    %0 = vector.load %arg1[%c0, %c0_0] : memref<8x784xf32, #tpu.memory_space<vmem>>, vector<8x784xf32>
    %1 = arith.truncf %0 : vector<8x784xf32> to vector<8x784xbf16>
    %c0_1 = arith.constant 0 : index
    %c0_2 = arith.constant 0 : index
    %2 = vector.load %arg2[%c0_1, %c0_2] : memref<784x256xbf16, #tpu.memory_space<vmem>>, vector<784x256xbf16>
    %cst = arith.constant dense<0.000000e+00> : vector<8x256xf32>
    %3 = tpu.matmul %1, %2, %cst {dimension_numbers = #tpu.dot_dimension_numbers<[1], [0], [0], [1], [0, 0, 1, 1], [], []>} : vector<8x784xbf16>, vector<784x256xbf16>, vector<8x256xf32> -> vector<8x256xf32>
    %c0_3 = arith.constant 0 : index
    %c0_4 = arith.constant 0 : index
    %4 = vector.load %arg3[%c0_3, %c0_4] : memref<1x256xf32, #tpu.memory_space<vmem>>, vector<1x256xf32>
    %5 = vector.broadcast %4 : vector<1x256xf32> to vector<8x256xf32>
    %6 = arith.addf %3, %5 : vector<8x256xf32>
    %cst_5 = arith.constant 0.000000e+00 : f32
    %7 = vector.broadcast %cst_5 : f32 to vector<8x256xf32>
    %8 = arith.maximumf %6, %7 : vector<8x256xf32>
    %9 = arith.truncf %8 : vector<8x256xf32> to vector<8x256xbf16>
    %c0_6 = arith.constant 0 : index
    %c0_7 = arith.constant 0 : index
    %10 = vector.load %arg4[%c0_6, %c0_7] : memref<256x256xbf16, #tpu.memory_space<vmem>>, vector<256x256xbf16>
    %cst_8 = arith.constant dense<0.000000e+00> : vector<8x256xf32>
    %11 = tpu.matmul %9, %10, %cst_8 {dimension_numbers = #tpu.dot_dimension_numbers<[1], [0], [0], [1], [0, 0, 1, 1], [], []>} : vector<8x256xbf16>, vector<256x256xbf16>, vector<8x256xf32> -> vector<8x256xf32>
    %c0_9 = arith.constant 0 : index
    %c0_10 = arith.constant 0 : index
    %12 = vector.load %arg5[%c0_9, %c0_10] : memref<1x256xf32, #tpu.memory_space<vmem>>, vector<1x256xf32>
    %13 = vector.broadcast %12 : vector<1x256xf32> to vector<8x256xf32>
    %14 = arith.addf %11, %13 : vector<8x256xf32>
    %cst_11 = arith.constant 0.000000e+00 : f32
    %15 = vector.broadcast %cst_11 : f32 to vector<8x256xf32>
    %16 = arith.maximumf %14, %15 : vector<8x256xf32>
    %17 = arith.truncf %16 : vector<8x256xf32> to vector<8x256xbf16>
    %c0_12 = arith.constant 0 : index
    %c0_13 = arith.constant 0 : index
    %18 = vector.load %arg6[%c0_12, %c0_13] : memref<256x128xbf16, #tpu.memory_space<vmem>>, vector<256x128xbf16>
    %cst_14 = arith.constant dense<0.000000e+00> : vector<8x128xf32>
    %19 = tpu.matmul %17, %18, %cst_14 {dimension_numbers = #tpu.dot_dimension_numbers<[1], [0], [0], [1], [0, 0, 1, 1], [], []>} : vector<8x256xbf16>, vector<256x128xbf16>, vector<8x128xf32> -> vector<8x128xf32>
    %c0_15 = arith.constant 0 : index
    %c0_16 = arith.constant 0 : index
    %20 = vector.load %arg7[%c0_15, %c0_16] : memref<1x128xf32, #tpu.memory_space<vmem>>, vector<1x128xf32>
    %21 = vector.broadcast %20 : vector<1x128xf32> to vector<8x128xf32>
    %22 = arith.addf %19, %21 : vector<8x128xf32>
    %23 = arith.truncf %22 : vector<8x128xf32> to vector<8x128xbf16>
    %c0_17 = arith.constant 0 : index
    %c0_18 = arith.constant 0 : index
    %24 = vector.load %arg8[%c0_17, %c0_18] : memref<8x128xbf16, #tpu.memory_space<vmem>>, vector<8x128xbf16>
    tpu.vector_store %arg8[%c0_17, %c0_18], %23 {strides = array<i32>} : memref<8x128xbf16, #tpu.memory_space<vmem>>, vector<8x128xbf16>,
    return
  }
  func.func @transform_0(%arg0: i32) -> (i32, i32) {
    %c0_i32 = arith.constant 0 : i32
    %c0_i32_0 = arith.constant 0 : i32
    return %arg0, %c0_i32 : i32, i32
  }
  func.func @transform_1(%arg0: i32) -> (i32, i32) {
    %c0_i32 = arith.constant 0 : i32
    %c0_i32_0 = arith.constant 0 : i32
    %c0_i32_1 = arith.constant 0 : i32
    return %c0_i32, %c0_i32_0 : i32, i32
  }
  func.func @transform_2(%arg0: i32) -> (i32, i32) {
    %c0_i32 = arith.constant 0 : i32
    %c0_i32_0 = arith.constant 0 : i32
    %c0_i32_1 = arith.constant 0 : i32
    return %c0_i32, %c0_i32_0 : i32, i32
  }
  func.func @transform_3(%arg0: i32) -> (i32, i32) {
    %c0_i32 = arith.constant 0 : i32
    %c0_i32_0 = arith.constant 0 : i32
    %c0_i32_1 = arith.constant 0 : i32
    return %c0_i32, %c0_i32_0 : i32, i32
  }
  func.func @transform_4(%arg0: i32) -> (i32, i32) {
    %c0_i32 = arith.constant 0 : i32
    %c0_i32_0 = arith.constant 0 : i32
    %c0_i32_1 = arith.constant 0 : i32
    return %c0_i32, %c0_i32_0 : i32, i32
  }
  func.func @transform_5(%arg0: i32) -> (i32, i32) {
    %c0_i32 = arith.constant 0 : i32
    %c0_i32_0 = arith.constant 0 : i32
    %c0_i32_1 = arith.constant 0 : i32
    return %c0_i32, %c0_i32_0 : i32, i32
  }
  func.func @transform_6(%arg0: i32) -> (i32, i32) {
    %c0_i32 = arith.constant 0 : i32
    %c0_i32_0 = arith.constant 0 : i32
    %c0_i32_1 = arith.constant 0 : i32
    return %c0_i32, %c0_i32_0 : i32, i32
  }
  func.func @transform_7(%arg0: i32) -> (i32, i32) {
    %c0_i32 = arith.constant 0 : i32
    %c0_i32_0 = arith.constant 0 : i32
    return %arg0, %c0_i32 : i32, i32
  }
}

</mosaic_0001>

<bundles_post_ra>
// kernel: ann_forward.1
= control target key start
LH: loop header
LB: loop body
LE: loop exit
PB: predicated region body
PF: predicated region fallthrough
CT: control target
= control target key end

     0   :  { %12 = vsyncpa [#allocation3], 0  ;;  %s2295_s0 = inlined_call_operand.hbm [shape: f32[8,784], index: 0, kind: input, shape index: {}]   ;;  %s2296_s1 = inlined_call_operand.hbm [shape: bf16[784,256], index: 1, kind: input, shape index: {}]   ;;  %s2297_s2 = inlined_call_operand.hbm [shape: f32[1,256], index: 2, kind: input, shape index: {}]   ;;  %s2298_s3 = inlined_call_operand.hbm [shape: bf16[256,256], index: 3, kind: input, shape index: {}]   ;;  %s2299_s4 = inlined_call_operand.vmem [shape: f32[1,256], index: 4, kind: input, shape index: {}]   ;;  %s2300_s5 = inlined_call_operand.hbm [shape: bf16[256,128], index: 5, kind: input, shape index: {}]   ;;  %s2301_s6 = inlined_call_operand.vmem [shape: f32[1,128], index: 6, kind: input, shape index: {}]   ;;  %s2302_s7 = inlined_call_operand.vmem [shape: bf16[8,128], index: 7, kind: output, shape index: {}]  }
   0x1   :  { %13 = vsyncpa [#allocation5], 0  ;;  %s30_s26 = sshll.u32 %s2296_s1, 4  ;;  %s31_s26 = int_to_ptr.hbm [resolvable:$true] %s30_s26 }
   0x2   :  { %14 = vsyncpa [#allocation8], 0  ;;  %s2188_s27 = smov [#allocation4]   ;;  %s54_s8 = sshll.u32 %s2298_s3, 4  ;;  %s55_s8 = int_to_ptr.hbm [resolvable:$true] %s54_s8 }
   0x3   :  { %s32_s28 = sshll.u32 %s2188_s27, 4  ;;  %s2189_s9 = smov 128   ;;  %s33_s28 = int_to_ptr.vmem [resolvable:$true] %s32_s28 }
   0x4   :  { %s2190_s10 = smov 8   ;;  %s2191_s11 = smov [#allocation7]  }
   0x5   :  { %38 = dma.hbm_to_vmem [thread:$0]  %s31_s26, 12544, %s33_s28, [#allocation5], %s2189_s9, %s2189_s9, %s2190_s10  }
   0x6   :  { %s56_s12 = sshll.u32 %s2191_s11, 4  ;;  %s20_s15 = sshll.u32 %s2295_s0, 4  ;;  %s57_s12 = int_to_ptr.vmem [resolvable:$true] %s56_s12  ;;  %s21_s15 = int_to_ptr.hbm [resolvable:$true] %s20_s15 }
   0x7   :  { %62 = dma.hbm_to_vmem [thread:$0]  %s55_s8, 4096, %s57_s12, [#allocation8], %s2189_s9, %s2189_s9, %s2190_s10  }
   0x8   :  { %s44_s17 = sshll.u32 %s2297_s2, 4  ;;  %s2192_s18 = smov [#allocation2]   ;;  %s45_s17 = int_to_ptr.hbm [resolvable:$true] %s44_s17 }
   0x9   :  { %s22_s19 = sshll.u32 %s2192_s18, 4  ;;  %s2193_s3 = smov [#allocation6]   ;;  %s23_s19 = int_to_ptr.vmem [resolvable:$true] %s22_s19 }
   0xa   :  { %25 = dma.hbm_to_vmem [thread:$0]  %s21_s15, 896, %s23_s19, [#allocation3]  }
   0xb   :  { %s46_s20 = sshll.u32 %s2193_s3, 4  ;;  %s69_s23 = sshll.u32 %s2300_s5, 4  ;;  %s47_s20 = int_to_ptr.vmem [resolvable:$true] %s46_s20  ;;  %s70_s23 = int_to_ptr.hbm [resolvable:$true] %s69_s23 }
   0xc   :  { %49 = dma.hbm_to_vmem [thread:$0]  %s45_s17, 32, %s47_s20, [#allocation5]  }
   0xd   :  { %s2194_s0 = smov [#allocation9]   ;;  %s2195_s25 = smov 64  }
   0xe   :  { %s71_s24 = sshll.u32 %s2194_s0, 4  ;;  %s2196_s26 = smov 4   ;;  %s72_s24 = int_to_ptr.vmem [resolvable:$true] %s71_s24 }
   0xf   :  { %77 = dma.hbm_to_vmem [thread:$0]  %s70_s23, 2048, %s72_s24, [#allocation8], %s2195_s25, %s2195_s25, %s2196_s26  }
  0x10   :  { %2182 = dma.done.wait [#allocation3], 896  }
  0x11   :  { %2183 = vsyncadd [#allocation3], 4294966400 }
  0x12   :  { %2184 = dma.done.wait [#allocation5], 12576  }
  0x13   :  { %2185 = vsyncadd [#allocation5], 4294954720 }
  0x14   :  { %2186 = dma.done.wait [#allocation8], 6144  }
  0x15   :  { %2187 = vsyncadd [#allocation8], 4294961152  ;;  %v1378_v0 = vld [vmem:[#allocation4 + $0x70] sm:$0xf]  ;;  %v1921_v1 = vld [vmem:[#allocation4 + $0x74] sm:$0xf0] }
  0x16   :  { %v1506_v2 = vld [vmem:[#allocation4 + $0x170] sm:$0xf]  ;;  %v1379_v3 = vor.u32 %v1921_v1, %v1378_v0  ;;  %v1953_v4 = vld [vmem:[#allocation4 + $0x174] sm:$0xf0]  ;;  %v1370_v11 = vld [vmem:[#allocation4 + $0x60] sm:$0xf] }
  0x17   :  { %v1570_v5 = vld [vmem:[#allocation4 + $0x1f0] sm:$0xf]  ;;  %v1969_v6 = vld [vmem:[#allocation4 + $0x1f4] sm:$0xf0]  ;;  %v1507_v7 = vor.u32 %v1953_v4, %v1506_v2  ;;  %v1919_v13 = vld [vmem:[#allocation4 + $0x64] sm:$0xf0] }
  0x18   :  { %v1571_v8 = vor.u32 %v1969_v6, %v1570_v5  ;;  %v1442_v9 = vld [vmem:[#allocation4 + $0xf0] sm:$0xf]  ;;  %v1937_v10 = vld [vmem:[#allocation4 + $0xf4] sm:$0xf0]  ;;  %713 = vmatpush.bf16.msra.mxu0 %v1379_v3  ;;  %v1498_v14 = vld [vmem:[#allocation4 + $0x160] sm:$0xf]  ;;  %v1371_v16 = vor.u32 %v1919_v13, %v1370_v11 }
  0x19   :  { %v1443_v12 = vor.u32 %v1937_v10, %v1442_v9  ;;  %v1951_v15 = vld [vmem:[#allocation4 + $0x164] sm:$0xf0]  ;;  %739 = vmatpush.bf16.msra.mxu2 %v1507_v7  ;;  %v1562_v18 = vld [vmem:[#allocation4 + $0x1e0] sm:$0xf]  ;;  %v1362_v23 = vld [vmem:[#allocation4 + $0x50] sm:$0xf] }
  0x1a   :  { %752 = vmatpush.bf16.msra.mxu3 %v1571_v8  ;;  %v1499_v17 = vor.u32 %v1951_v15, %v1498_v14  ;;  %v1967_v19 = vld [vmem:[#allocation4 + $0x1e4] sm:$0xf0]  ;;  %v1434_v20 = vld [vmem:[#allocation4 + $0xe0] sm:$0xf]  ;;  %v1917_v24 = vld [vmem:[#allocation4 + $0x54] sm:$0xf0] }
  0x1b   :  { %726 = vmatpush.bf16.msra.mxu1 %v1443_v12  ;;  %v1563_v21 = vor.u32 %v1967_v19, %v1562_v18  ;;  %v1935_v22 = vld [vmem:[#allocation4 + $0xe4] sm:$0xf0]  ;;  %v1490_v26 = vld [vmem:[#allocation4 + $0x150] sm:$0xf]  ;;  %v1949_v27 = vld [vmem:[#allocation4 + $0x154] sm:$0xf0]  ;;  %v1363_v29 = vor.u32 %v1917_v24, %v1362_v23 }
  0x1c   :  { %v1435_v25 = vor.u32 %v1935_v22, %v1434_v20  ;;  %v1554_v28 = vld [vmem:[#allocation4 + $0x1d0] sm:$0xf]  ;;  %714 = vmatpush.bf16.msra.mxu0 %v1371_v16  ;;  %v1965_v30 = vld [vmem:[#allocation4 + $0x1d4] sm:$0xf0]  ;;  %v1491_v33 = vor.u32 %v1949_v27, %v1490_v26  ;;  %v1354_v35 = vld [vmem:[#allocation4 + $0x40] sm:$0xf] }
  0x1d   :  { %v1426_v31 = vld [vmem:[#allocation4 + $0xd0] sm:$0xf]  ;;  %v1933_v32 = vld [vmem:[#allocation4 + $0xd4] sm:$0xf0]  ;;  %740 = vmatpush.bf16.msra.mxu2 %v1499_v17  ;;  %v1555_v34 = vor.u32 %v1965_v30, %v1554_v28  ;;  %v1915_v36 = vld [vmem:[#allocation4 + $0x44] sm:$0xf0] }
  0x1e   :  { %753 = vmatpush.bf16.msra.mxu3 %v1563_v21  ;;  %v1482_v37 = vld [vmem:[#allocation4 + $0x140] sm:$0xf]  ;;  %v1427_v38 = vor.u32 %v1933_v32, %v1426_v31  ;;  %v1947_v39 = vld [vmem:[#allocation4 + $0x144] sm:$0xf0]  ;;  %v1355_v44 = vor.u32 %v1915_v36, %v1354_v35  ;;  %v1346_v47 = vld [vmem:[#allocation4 + $0x30] sm:$0xf] }
  0x1f   :  { %727 = vmatpush.bf16.msra.mxu1 %v1435_v25  ;;  %v1546_v40 = vld [vmem:[#allocation4 + $0x1c0] sm:$0xf]  ;;  %v1963_v41 = vld [vmem:[#allocation4 + $0x1c4] sm:$0xf0]  ;;  %v1483_v45 = vor.u32 %v1947_v39, %v1482_v37  ;;  %v1913_v48 = vld [vmem:[#allocation4 + $0x34] sm:$0xf0] }
  0x20   :  { %v1418_v42 = vld [vmem:[#allocation4 + $0xc0] sm:$0xf]  ;;  %v1931_v43 = vld [vmem:[#allocation4 + $0xc4] sm:$0xf0]  ;;  %715 = vmatpush.bf16.msra.mxu0 %v1363_v29  ;;  %v1547_v46 = vor.u32 %v1963_v41, %v1546_v40  ;;  %v1474_v49 = vld [vmem:[#allocation4 + $0x130] sm:$0xf]  ;;  %v1347_v56 = vor.u32 %v1913_v48, %v1346_v47 }
  0x21   :  { %741 = vmatpush.bf16.msra.mxu2 %v1491_v33  ;;  %v1419_v50 = vor.u32 %v1931_v43, %v1418_v42  ;;  %v1945_v51 = vld [vmem:[#allocation4 + $0x134] sm:$0xf0]  ;;  %v1538_v52 = vld [vmem:[#allocation4 + $0x1b0] sm:$0xf]  ;;  %v1338_v59 = vld [vmem:[#allocation4 + $0x20] sm:$0xf] }
  0x22   :  { %754 = vmatpush.bf16.msra.mxu3 %v1555_v34  ;;  %v1961_v53 = vld [vmem:[#allocation4 + $0x1b4] sm:$0xf0]  ;;  %v1410_v54 = vld [vmem:[#allocation4 + $0xb0] sm:$0xf]  ;;  %v1475_v57 = vor.u32 %v1945_v51, %v1474_v49  ;;  %v1911_v60 = vld [vmem:[#allocation4 + $0x24] sm:$0xf0] }
  0x23   :  { %728 = vmatpush.bf16.msra.mxu1 %v1427_v38  ;;  %v1929_v55 = vld [vmem:[#allocation4 + $0xb4] sm:$0xf0]  ;;  %v1539_v58 = vor.u32 %v1961_v53, %v1538_v52  ;;  %v1466_v61 = vld [vmem:[#allocation4 + $0x120] sm:$0xf]  ;;  %v1943_v63 = vld [vmem:[#allocation4 + $0x124] sm:$0xf0]  ;;  %v1339_v4 = vor.u32 %v1911_v60, %v1338_v59 }
  0x24   :  { %716 = vmatpush.bf16.msra.mxu0 %v1355_v44  ;;  %v1411_v62 = vor.u32 %v1929_v55, %v1410_v54  ;;  %v1530_v0 = vld [vmem:[#allocation4 + $0x1a0] sm:$0xf]  ;;  %v1959_v1 = vld [vmem:[#allocation4 + $0x1a4] sm:$0xf0]  ;;  %v1467_v5 = vor.u32 %v1943_v63, %v1466_v61  ;;  %v1330_v7 = vld [vmem:[#allocation4 + $0x10] sm:$0xf] }
  0x25   :  { %742 = vmatpush.bf16.msra.mxu2 %v1483_v45  ;;  %v1402_v2 = vld [vmem:[#allocation4 + $0xa0] sm:$0xf]  ;;  %v1927_v3 = vld [vmem:[#allocation4 + $0xa4] sm:$0xf0]  ;;  %v1531_v6 = vor.u32 %v1959_v1, %v1530_v0  ;;  %v1909_v8 = vld [vmem:[#allocation4 + $0x14] sm:$0xf0] }
  0x26   :  { %755 = vmatpush.bf16.msra.mxu3 %v1547_v46  ;;  %v1458_v9 = vld [vmem:[#allocation4 + $0x110] sm:$0xf]  ;;  %v1403_v10 = vor.u32 %v1927_v3, %v1402_v2  ;;  %v1941_v11 = vld [vmem:[#allocation4 + $0x114] sm:$0xf0]  ;;  %v1331_v16 = vor.u32 %v1909_v8, %v1330_v7  ;;  %v1322_v17 = vld [vmem:[#allocation4] sm:$0xf] }
  0x27   :  { %729 = vmatpush.bf16.msra.mxu1 %v1419_v50  ;;  %v1522_v12 = vld [vmem:[#allocation4 + $0x190] sm:$0xf]  ;;  %v1957_v13 = vld [vmem:[#allocation4 + $0x194] sm:$0xf0]  ;;  %v1907_v18 = vld [vmem:[#allocation4 + $0x4] sm:$0xf0]  ;;  %v1459_v20 = vor.u32 %v1941_v11, %v1458_v9 }
  0x28   :  { %717 = vmatpush.bf16.msra.mxu0 %v1347_v56  ;;  %v1394_v14 = vld [vmem:[#allocation4 + $0x90] sm:$0xf]  ;;  %v1925_v15 = vld [vmem:[#allocation4 + $0x94] sm:$0xf0]  ;;  %v1450_v19 = vld [vmem:[#allocation4 + $0x100] sm:$0xf]  ;;  %v1523_v21 = vor.u32 %v1957_v13, %v1522_v12  ;;  %v1323_v32 = vor.u32 %v1907_v18, %v1322_v17 }
  0x29   :  { %743 = vmatpush.bf16.msra.mxu2 %v1475_v57  ;;  %v1939_v22 = vld [vmem:[#allocation4 + $0x104] sm:$0xf0]  ;;  %v1514_v23 = vld [vmem:[#allocation4 + $0x180] sm:$0xf]  ;;  %v1395_v25 = vor.u32 %v1925_v15, %v1394_v14  ;;  %v1634_v26 = vld [vmem:[#allocation4 + $0x270] sm:$0xf] }
  0x2a   :  { %756 = vmatpush.bf16.msra.mxu3 %v1539_v58  ;;  %v1955_v24 = vld [vmem:[#allocation4 + $0x184] sm:$0xf0]  ;;  %v1985_v27 = vld [vmem:[#allocation4 + $0x274] sm:$0xf0]  ;;  %v1920_v28 = vld [vmem:[#allocation4 + $0x74] sm:$0xf]  ;;  %v1451_v36 = vor.u32 %v1939_v22, %v1450_v19 }
  0x2b   :  { %730 = vmatpush.bf16.msra.mxu1 %v1411_v62  ;;  %v1380_v29 = vld [vmem:[#allocation4 + $0x78] sm:$0xf0]  ;;  %v1386_v30 = vld [vmem:[#allocation4 + $0x80] sm:$0xf]  ;;  %v1923_v31 = vld [vmem:[#allocation4 + $0x84] sm:$0xf0]  ;;  %v1515_v37 = vor.u32 %v1955_v24, %v1514_v23  ;;  %v1635_v41 = vor.u32 %v1985_v27, %v1634_v26 }
  0x2c   :  { %718 = vmatpush.bf16.msra.mxu0 %v1339_v4  ;;  %v103_v33 = vld [vmem:[#allocation2 + $0x10] sm:$0xff]  ;;  %v1706_v34 = vld [vmem:[#allocation4 + $0x300] sm:$0xf]  ;;  %v2003_v35 = vld [vmem:[#allocation4 + $0x304] sm:$0xf0]  ;;  %v1383_v42 = vor.u32 %v1920_v28, %v1380_v29  ;;  %v1387_v46 = vor.u32 %v1923_v31, %v1386_v30  ;;  %vm709_vm0 = vcmask 130048  }
  0x2d   :  { %744 = vmatpush.bf16.msra.mxu2 %v1467_v5  ;;  %v1698_v38 = vld [vmem:[#allocation4 + $0x2f0] sm:$0xf]  ;;  %v2001_v39 = vld [vmem:[#allocation4 + $0x2f4] sm:$0xf0]  ;;  %v1936_v40 = vld [vmem:[#allocation4 + $0xf4] sm:$0xf]  ;;  %v1707_v47 = vor.u32 %v2003_v35, %v1706_v34  ;;  %v2252_v51 = vpack.c.bf16 %v103_v33, %v103_v33 }
  0x2e   :  { %757 = vmatpush.bf16.msra.mxu3 %v1531_v6  ;;  %v1444_v43 = vld [vmem:[#allocation4 + $0xf8] sm:$0xf0]  ;;  %v1626_v44 = vld [vmem:[#allocation4 + $0x260] sm:$0xf]  ;;  %v101_v45 = vld [vmem:[#allocation2] sm:$0xff]  ;;  %v1699_v52 = vor.u32 %v2001_v39, %v1698_v38 }
  0x2f   :  { %731 = vmatpush.bf16.msra.mxu1 %v1403_v10  ;;  %v1983_v48 = vld [vmem:[#allocation4 + $0x264] sm:$0xf0]  ;;  %v1918_v49 = vld [vmem:[#allocation4 + $0x64] sm:$0xf]  ;;  %v1372_v50 = vld [vmem:[#allocation4 + $0x68] sm:$0xf0]  ;;  %v1447_v55 = vor.u32 %v1936_v40, %v1444_v43  ;;  %v2254_v58 = vpack.c.bf16 %v101_v45, %v101_v45 }
  0x30   :  { %719 = vmatpush.bf16.msra.mxu0 %v1331_v16  ;;  %v104_v53 = vld [vmem:[#allocation2 + $0x18] sm:$0xff]  ;;  %v102_v54 = vld [vmem:[#allocation2 + $0x8] sm:$0xff]  ;;  %v1999_v57 = vld [vmem:[#allocation4 + $0x2e4] sm:$0xf0]  ;;  %v1627_v59 = vor.u32 %v1983_v48, %v1626_v44  ;;  %v1375_v60 = vor.u32 %v1918_v49, %v1372_v50 }
  0x31   :  { %745 = vmatpush.bf16.msra.mxu2 %v1459_v20  ;;  %v1690_v56 = vld [vmem:[#allocation4 + $0x2e0] sm:$0xf]  ;;  %v1934_v61 = vld [vmem:[#allocation4 + $0xe4] sm:$0xf]  ;;  %v1436_v62 = vld [vmem:[#allocation4 + $0xe8] sm:$0xf0]  ;;  %v2256_v3 = vpack.c.bf16 %v104_v53, %v104_v53  ;;  %v2258_v4 = vpack.c.bf16 %v102_v54, %v102_v54 }
  0x32   :  { %758 = vmatpush.bf16.msra.mxu3 %v1523_v21  ;;  %v1618_v63 = vld [vmem:[#allocation4 + $0x250] sm:$0xf]  ;;  %v1981_v0 = vld [vmem:[#allocation4 + $0x254] sm:$0xf0]  ;;  %v1916_v1 = vld [vmem:[#allocation4 + $0x54] sm:$0xf]  ;;  %v1691_v5 = vor.u32 %v1999_v57, %v1690_v56  ;;  %v1439_v6 = vor.u32 %v1934_v61, %v1436_v62 }
  0x33   :  { %732 = vmatpush.bf16.msra.mxu1 %v1395_v25  ;;  %v1364_v2 = vld [vmem:[#allocation4 + $0x58] sm:$0xf0]  ;;  %v1682_v7 = vld [vmem:[#allocation4 + $0x2d0] sm:$0xf]  ;;  %v1997_v8 = vld [vmem:[#allocation4 + $0x2d4] sm:$0xf0]  ;;  %v1619_v9 = vor.u32 %v1981_v0, %v1618_v63 }
  0x34   :  { %720 = vmatpush.bf16.msra.mxu0 %v1323_v32  ;;  %v1367_v10 = vor.u32 %v1916_v1, %v1364_v2  ;;  %v1932_v11 = vld [vmem:[#allocation4 + $0xd4] sm:$0xf]  ;;  %v1428_v12 = vld [vmem:[#allocation4 + $0xd8] sm:$0xf0]  ;;  %v1610_v13 = vld [vmem:[#allocation4 + $0x240] sm:$0xf]  ;;  %v1683_v17 = vor.u32 %v1997_v8, %v1682_v7 }
  0x35   :  { %746 = vmatpush.bf16.msra.mxu2 %v1451_v36  ;;  %v1979_v14 = vld [vmem:[#allocation4 + $0x244] sm:$0xf0]  ;;  %v1914_v15 = vld [vmem:[#allocation4 + $0x44] sm:$0xf]  ;;  %v1356_v16 = vld [vmem:[#allocation4 + $0x48] sm:$0xf0]  ;;  %v1431_v18 = vor.u32 %v1932_v11, %v1428_v12 }
  0x36   :  { %759 = vmatpush.bf16.msra.mxu3 %v1515_v37  ;;  %v1674_v19 = vld [vmem:[#allocation4 + $0x2c0] sm:$0xf]  ;;  %v1995_v20 = vld [vmem:[#allocation4 + $0x2c4] sm:$0xf0]  ;;  %v1611_v21 = vor.u32 %v1979_v14, %v1610_v13  ;;  %v1359_v22 = vor.u32 %v1914_v15, %v1356_v16  ;;  %v1930_v23 = vld [vmem:[#allocation4 + $0xc4] sm:$0xf] }
  0x37   :  { %733 = vmatpush.bf16.msra.mxu1 %v1387_v46  ;;  %721 = vmatmul.bf16.vlgmr.msra.gmra.mxu0 %v2254_v58  ;;  %v1420_v24 = vld [vmem:[#allocation4 + $0xc8] sm:$0xf0]  ;;  %v1602_v25 = vld [vmem:[#allocation4 + $0x230] sm:$0xf]  ;;  %v1977_v26 = vld [vmem:[#allocation4 + $0x234] sm:$0xf0]  ;;  %v1675_v29 = vor.u32 %v1995_v20, %v1674_v19 }
  0x38   :  { %765 = vmatpush.bf16.msrb.mxu0 %v1635_v41  ;;  %747 = vmatmul.bf16.vlgmr.msra.gmra.mxu2 %v2252_v51  ;;  %v1912_v27 = vld [vmem:[#allocation4 + $0x34] sm:$0xf]  ;;  %v1348_v28 = vld [vmem:[#allocation4 + $0x38] sm:$0xf0]  ;;  %v1423_v30 = vor.u32 %v1930_v23, %v1420_v24  ;;  %v1666_v31 = vld [vmem:[#allocation4 + $0x2b0] sm:$0xf]  ;;  %v1603_v34 = vor.u32 %v1977_v26, %v1602_v25 }
  0x39   :  { %798 = vmatpush.bf16.msrb.mxu2 %v1707_v47  ;;  %760 = vmatmul.bf16.vlgmr.msra.gmra.mxu3 %v2256_v3  ;;  %v1993_v32 = vld [vmem:[#allocation4 + $0x2b4] sm:$0xf0]  ;;  %v1351_v35 = vor.u32 %v1912_v27, %v1348_v28  ;;  %v1928_v36 = vld [vmem:[#allocation4 + $0xb4] sm:$0xf]  ;;  %v1412_v37 = vld [vmem:[#allocation4 + $0xb8] sm:$0xf0] }
  0x3a   :  { %804 = vmatpush.bf16.msrb.mxu3 %v1383_v42  ;;  %734 = vmatmul.bf16.vlgmr.msra.gmra.mxu1 %v2258_v4  ;;  %v107_v33 = vld [vmem:[#allocation2 + $0x30] sm:$0xff]  ;;  %v1594_v38 = vld [vmem:[#allocation4 + $0x220] sm:$0xf]  ;;  %v1975_v39 = vld [vmem:[#allocation4 + $0x224] sm:$0xf0]  ;;  %v1667_v42 = vor.u32 %v1993_v32, %v1666_v31  ;;  %v1415_v44 = vor.u32 %v1928_v36, %v1412_v37 }
  0x3b   :  { %778 = vmatpush.bf16.msrb.mxu1 %v1699_v52  ;;  %v1910_v40 = vld [vmem:[#allocation4 + $0x24] sm:$0xf]  ;;  %v1340_v41 = vld [vmem:[#allocation4 + $0x28] sm:$0xf0]  ;;  %v2264_v43 = vpack.c.bf16 %v107_v33, %v107_v33  ;;  %v1658_v45 = vld [vmem:[#allocation4 + $0x2a0] sm:$0xf]  ;;  %v1595_v47 = vor.u32 %v1975_v39, %v1594_v38 }
  0x3c   :  { %766 = vmatpush.bf16.msrb.mxu0 %v1627_v59  ;;  %v1991_v46 = vld [vmem:[#allocation4 + $0x2a4] sm:$0xf0]  ;;  %v1343_v48 = vor.u32 %v1910_v40, %v1340_v41  ;;  %v1926_v49 = vld [vmem:[#allocation4 + $0xa4] sm:$0xf]  ;;  %v1404_v50 = vld [vmem:[#allocation4 + $0xa8] sm:$0xf0] }
  0x3d   :  { %817 = vmatpush.bf16.msra.mxu2 %v1447_v55  ;;  %v1586_v52 = vld [vmem:[#allocation4 + $0x210] sm:$0xf]  ;;  %v1973_v53 = vld [vmem:[#allocation4 + $0x214] sm:$0xf0]  ;;  %v1908_v54 = vld [vmem:[#allocation4 + $0x14] sm:$0xf]  ;;  %v1659_v56 = vor.u32 %v1991_v46, %v1658_v45  ;;  %v1407_v57 = vor.u32 %v1926_v49, %v1404_v50 }
  0x3e   :  { %805 = vmatpush.bf16.msrb.mxu3 %v1375_v60  ;;  %v1332_v55 = vld [vmem:[#allocation4 + $0x18] sm:$0xf0]  ;;  %v1650_v59 = vld [vmem:[#allocation4 + $0x290] sm:$0xf]  ;;  %v1989_v60 = vld [vmem:[#allocation4 + $0x294] sm:$0xf0]  ;;  %v1587_v62 = vor.u32 %v1973_v53, %v1586_v52 }
  0x3f   :  { %779 = vmatpush.bf16.msrb.mxu1 %v1691_v5  ;;  %v1924_v61 = vld [vmem:[#allocation4 + $0x94] sm:$0xf]  ;;  %v1335_v63 = vor.u32 %v1908_v54, %v1332_v55  ;;  %v1396_v0 = vld [vmem:[#allocation4 + $0x98] sm:$0xf0]  ;;  %v1578_v1 = vld [vmem:[#allocation4 + $0x200] sm:$0xf]  ;;  %v1651_v8 = vor.u32 %v1989_v60, %v1650_v59 }
  0x40   :  { %767 = vmatpush.bf16.msrb.mxu0 %v1619_v9  ;;  %v1971_v2 = vld [vmem:[#allocation4 + $0x204] sm:$0xf0]  ;;  %v1906_v5 = vld [vmem:[#allocation4 + $0x4] sm:$0xf]  ;;  %v1952_v7 = vld [vmem:[#allocation4 + $0x174] sm:$0xf]  ;;  %v1399_v12 = vor.u32 %v1924_v61, %v1396_v0 }
  0x41   :  { %818 = vmatpush.bf16.msra.mxu2 %v1439_v6  ;;  %v1324_v6 = vld [vmem:[#allocation4 + $0x8] sm:$0xf0]  ;;  %v1508_v9 = vld [vmem:[#allocation4 + $0x178] sm:$0xf0]  ;;  %v1642_v13 = vld [vmem:[#allocation4 + $0x280] sm:$0xf]  ;;  %v1579_v16 = vor.u32 %v1971_v2, %v1578_v1 }
  0x42   :  { %806 = vmatpush.bf16.msrb.mxu3 %v1367_v10  ;;  %v1984_v10 = vld [vmem:[#allocation4 + $0x274] sm:$0xf]  ;;  %v1636_v11 = vld [vmem:[#allocation4 + $0x278] sm:$0xf0]  ;;  %v1987_v14 = vld [vmem:[#allocation4 + $0x284] sm:$0xf0] }
  0x43   :  { %780 = vmatpush.bf16.msrb.mxu1 %v1683_v17  ;;  %v105_v15 = vld [vmem:[#allocation2 + $0x20] sm:$0xff]  ;;  %v1327_v17 = vor.u32 %v1906_v5, %v1324_v6  ;;  %v1968_v20 = vld [vmem:[#allocation4 + $0x1f4] sm:$0xf]  ;;  %v1572_v23 = vld [vmem:[#allocation4 + $0x1f8] sm:$0xf0]  ;;  %v1643_v26 = vor.u32 %v1987_v14, %v1642_v13 }
  0x44   :  { %768 = vmatpush.bf16.msrb.mxu0 %v1611_v21  ;;  %v1388_v19 = vld [vmem:[#allocation4 + $0x88] sm:$0xf0]  ;;  %v1511_v21 = vor.u32 %v1952_v7, %v1508_v9  ;;  %v2000_v24 = vld [vmem:[#allocation4 + $0x2f4] sm:$0xf]  ;;  %v1700_v25 = vld [vmem:[#allocation4 + $0x2f8] sm:$0xf0] }
  0x45   :  { %819 = vmatpush.bf16.msra.mxu2 %v1431_v18  ;;  %v1922_v18 = vld [vmem:[#allocation4 + $0x84] sm:$0xf]  ;;  %v106_v27 = vld [vmem:[#allocation2 + $0x28] sm:$0xff]  ;;  %v1628_v33 = vld [vmem:[#allocation4 + $0x268] sm:$0xf0] }
  0x46   :  { %807 = vmatpush.bf16.msrb.mxu3 %v1359_v22  ;;  %v1639_v22 = vor.u32 %v1984_v10, %v1636_v11  ;;  %v1950_v28 = vld [vmem:[#allocation4 + $0x164] sm:$0xf]  ;;  %v1391_v31 = vor.u32 %v1922_v18, %v1388_v19  ;;  %v2270_v37 = vpack.c.bf16 %v106_v27, %v106_v27  ;;  %v1564_v39 = vld [vmem:[#allocation4 + $0x1e8] sm:$0xf0]  ;;  %v1492_v45 = vld [vmem:[#allocation4 + $0x158] sm:$0xf0] }
  0x47   :  { %781 = vmatpush.bf16.msrb.mxu1 %v1675_v29  ;;  %v1500_v29 = vld [vmem:[#allocation4 + $0x168] sm:$0xf0]  ;;  %v1982_v32 = vld [vmem:[#allocation4 + $0x264] sm:$0xf]  ;;  %v1980_v46 = vld [vmem:[#allocation4 + $0x254] sm:$0xf] }
  0x48   :  { %769 = vmatpush.bf16.msrb.mxu0 %v1603_v34  ;;  %1712 = vmatmul.msk.bf16.vlgmr.msrb.gmra.mxu2 %vm709_vm0, %v2264_v43  ;;  %v1575_v34 = vor.u32 %v1968_v20, %v1572_v23  ;;  %v1966_v36 = vld [vmem:[#allocation4 + $0x1e4] sm:$0xf]  ;;  %v1503_v38 = vor.u32 %v1950_v28, %v1500_v29  ;;  %v1692_v41 = vld [vmem:[#allocation4 + $0x2e8] sm:$0xf0]  ;;  %v1964_v50 = vld [vmem:[#allocation4 + $0x1d4] sm:$0xf] }
  0x49   :  { %820 = vmatpush.bf16.msra.mxu2 %v1423_v30  ;;  %v2268_v30 = vpack.c.bf16 %v105_v15, %v105_v15  ;;  %v1998_v40 = vld [vmem:[#allocation4 + $0x2e4] sm:$0xf]  ;;  %v1556_v53 = vld [vmem:[#allocation4 + $0x1d8] sm:$0xf0]  ;;  %v1996_v54 = vld [vmem:[#allocation4 + $0x2d4] sm:$0xf] }
  0x4a   :  { %808 = vmatpush.bf16.msrb.mxu3 %v1351_v35  ;;  %v1703_v35 = vor.u32 %v2000_v24, %v1700_v25  ;;  %v1695_v49 = vor.u32 %v1998_v40, %v1692_v41  ;;  %v1684_v55 = vld [vmem:[#allocation4 + $0x2d8] sm:$0xf0]  ;;  %v1484_v59 = vld [vmem:[#allocation4 + $0x148] sm:$0xf0]  ;;  %v1978_v60 = vld [vmem:[#allocation4 + $0x244] sm:$0xf] }
  0x4b   :  { %782 = vmatpush.bf16.msrb.mxu1 %v1667_v42  ;;  %v1631_v42 = vor.u32 %v1982_v32, %v1628_v33  ;;  %v1612_v61 = vld [vmem:[#allocation4 + $0x248] sm:$0xf0]  ;;  %v1962_v0 = vld [vmem:[#allocation4 + $0x1c4] sm:$0xf]  ;;  %v1476_v9 = vld [vmem:[#allocation4 + $0x138] sm:$0xf0] }
  0x4c   :  { %770 = vmatpush.bf16.msrb.mxu0 %v1595_v47  ;;  %v1620_v47 = vld [vmem:[#allocation4 + $0x258] sm:$0xf0]  ;;  %v1548_v2 = vld [vmem:[#allocation4 + $0x1c8] sm:$0xf0]  ;;  %v1994_v5 = vld [vmem:[#allocation4 + $0x2c4] sm:$0xf]  ;;  %v1615_v7 = vor.u32 %v1978_v60, %v1612_v61 }
  0x4d   :  { %821 = vmatpush.bf16.msra.mxu2 %v1415_v44  ;;  %v1948_v44 = vld [vmem:[#allocation4 + $0x154] sm:$0xf]  ;;  %v1676_v6 = vld [vmem:[#allocation4 + $0x2c8] sm:$0xf0]  ;;  %v1551_v11 = vor.u32 %v1962_v0, %v1548_v2  ;;  %v1540_v14 = vld [vmem:[#allocation4 + $0x1b8] sm:$0xf0] }
  0x4e   :  { %809 = vmatpush.bf16.msrb.mxu3 %v1343_v48  ;;  %v1567_v48 = vor.u32 %v1966_v36, %v1564_v39  ;;  %v1495_v52 = vor.u32 %v1948_v44, %v1492_v45  ;;  %v1976_v10 = vld [vmem:[#allocation4 + $0x234] sm:$0xf]  ;;  %v1942_v18 = vld [vmem:[#allocation4 + $0x124] sm:$0xf]  ;;  %v1468_v19 = vld [vmem:[#allocation4 + $0x128] sm:$0xf0] }
  0x4f   :  { %783 = vmatpush.bf16.msrb.mxu1 %v1659_v56  ;;  %v1623_v56 = vor.u32 %v1980_v46, %v1620_v47  ;;  %v1992_v15 = vld [vmem:[#allocation4 + $0x2b4] sm:$0xf]  ;;  %v1974_v20 = vld [vmem:[#allocation4 + $0x224] sm:$0xf]  ;;  %v1471_v25 = vor.u32 %v1942_v18, %v1468_v19  ;;  %v1660_v28 = vld [vmem:[#allocation4 + $0x2a8] sm:$0xf0] }
  0x50   :  { %771 = vmatpush.bf16.msrb.mxu0 %v1587_v62  ;;  %v1559_v62 = vor.u32 %v1964_v50, %v1556_v53  ;;  %v1958_v24 = vld [vmem:[#allocation4 + $0x1a4] sm:$0xf]  ;;  %v1460_v32 = vld [vmem:[#allocation4 + $0x118] sm:$0xf0]  ;;  %v1972_v33 = vld [vmem:[#allocation4 + $0x214] sm:$0xf] }
  0x51   :  { %822 = vmatpush.bf16.msra.mxu2 %v1407_v57  ;;  %v1946_v57 = vld [vmem:[#allocation4 + $0x144] sm:$0xf]  ;;  %v1524_v40 = vld [vmem:[#allocation4 + $0x198] sm:$0xf0]  ;;  %v1988_v41 = vld [vmem:[#allocation4 + $0x294] sm:$0xf] }
  0x52   :  { %810 = vmatpush.bf16.msrb.mxu3 %v1335_v63  ;;  %v1687_v63 = vor.u32 %v1996_v54, %v1684_v55  ;;  %v1487_v1 = vor.u32 %v1946_v57, %v1484_v59  ;;  %v1990_v27 = vld [vmem:[#allocation4 + $0x2a4] sm:$0xf]  ;;  %v1452_v46 = vld [vmem:[#allocation4 + $0x108] sm:$0xf0] }
  0x53   :  { %784 = vmatpush.bf16.msrb.mxu1 %v1651_v8  ;;  %v1944_v8 = vld [vmem:[#allocation4 + $0x134] sm:$0xf]  ;;  %v1663_v36 = vor.u32 %v1990_v27, %v1660_v28  ;;  %v1938_v45 = vld [vmem:[#allocation4 + $0x104] sm:$0xf]  ;;  %v1708_v50 = vld [vmem:[#allocation4 + $0x308] sm:$0xf0] }
  0x54   :  { %772 = vmatpush.bf16.msrb.mxu0 %v1579_v16  ;;  %v1479_v13 = vor.u32 %v1944_v8, %v1476_v9  ;;  %v1668_v16 = vld [vmem:[#allocation4 + $0x2b8] sm:$0xf0]  ;;  %v1970_v47 = vld [vmem:[#allocation4 + $0x204] sm:$0xf]  ;;  %v1455_v54 = vor.u32 %v1938_v45, %v1452_v46  ;;  %v1644_v60 = vld [vmem:[#allocation4 + $0x288] sm:$0xf0] }
  0x55   :  { %823 = vmatpush.bf16.msra.mxu2 %v1399_v12  ;;  %v1960_v12 = vld [vmem:[#allocation4 + $0x1b4] sm:$0xf]  ;;  %v1671_v23 = vor.u32 %v1992_v15, %v1668_v16  ;;  %v1954_v55 = vld [vmem:[#allocation4 + $0x184] sm:$0xf]  ;;  %v2017_v9 = vld [vmem:[#allocation7 + $0x64] sm:$0xf0] }
  0x56   :  { %811 = vmatpush.bf16.msrb.mxu3 %v1327_v17  ;;  %v1986_v59 = vld [vmem:[#allocation4 + $0x284] sm:$0xf]  ;;  %v1764_v8 = vld [vmem:[#allocation7 + $0x60] sm:$0xf]  ;;  %v2012_v15 = vld [vmem:[#allocation7 + $0x44] sm:$0xf] }
  0x57   :  { %785 = vmatpush.bf16.msrb.mxu1 %v1643_v26  ;;  %773 = vmatmul.bf16.vlgmr.msrb.gmra.mxu0 %v2268_v30  ;;  %v1532_v26 = vld [vmem:[#allocation4 + $0x1a8] sm:$0xf0]  ;;  %v1772_v0 = vld [vmem:[#allocation7 + $0x70] sm:$0xf]  ;;  %v1750_v16 = vld [vmem:[#allocation7 + $0x48] sm:$0xf0] }
  0x58   :  { %830 = vmatpush.bf16.msra.mxu0 %v1511_v21  ;;  %v1596_v21 = vld [vmem:[#allocation4 + $0x228] sm:$0xf0]  ;;  %v1753_v18 = vor.u32 %v2012_v15, %v1750_v16  ;;  %v1740_v19 = vld [vmem:[#allocation7 + $0x30] sm:$0xf]  ;;  %v2008_v27 = vld [vmem:[#allocation7 + $0x24] sm:$0xf] }
  0x59   :  { %824 = vmatpush.bf16.msra.mxu2 %v1391_v31  ;;  %812 = vmatmul.bf16.vlgmr.msrb.gmra.mxu3 %v2254_v58  ;;  %v1679_v58 = vor.u32 %v1994_v5, %v1676_v6  ;;  %v1599_v29 = vor.u32 %v1974_v20, %v1596_v21  ;;  %v1940_v31 = vld [vmem:[#allocation4 + $0x114] sm:$0xf]  ;;  %v2018_v5 = vld [vmem:[#allocation7 + $0x74] sm:$0xf]  ;;  %v1774_v6 = vld [vmem:[#allocation7 + $0x78] sm:$0xf0] }
  0x5a   :  { %856 = vmatpush.bf16.msra.mxu3 %v1639_v22  ;;  %786 = vmatmul.bf16.vlgmr.msrb.gmra.mxu1 %v2270_v37  ;;  %v1543_v22 = vor.u32 %v1960_v12, %v1540_v14  ;;  %v1463_v39 = vor.u32 %v1940_v31, %v1460_v32  ;;  %v1748_v12 = vld [vmem:[#allocation7 + $0x40] sm:$0xf]  ;;  %v2011_v20 = vld [vmem:[#allocation7 + $0x34] sm:$0xf0]  ;;  %v2010_v21 = vld [vmem:[#allocation7 + $0x34] sm:$0xf] }
  0x5b   :  { %843 = vmatpush.bf16.msra.mxu1 %v1575_v34  ;;  %v1588_v34 = vld [vmem:[#allocation4 + $0x218] sm:$0xf0]  ;;  %v1724_v32 = vld [vmem:[#allocation7 + $0x10] sm:$0xf] }
  0x5c   :  { %831 = vmatpush.bf16.msra.mxu0 %v1503_v38  ;;  %825 = vmatmul.bf16.vlgmr.msra.gmra.mxu2 %v2258_v4  ;;  %v1604_v4 = vld [vmem:[#allocation4 + $0x238] sm:$0xf0]  ;;  %v1956_v38 = vld [vmem:[#allocation4 + $0x194] sm:$0xf]  ;;  %v1591_v44 = vor.u32 %v1972_v33, %v1588_v34  ;;  %v2007_v33 = vld [vmem:[#allocation7 + $0x14] sm:$0xf0] }
  0x5d   :  { %869 = vmatpush.bf16.msrb.mxu2 %v1703_v35  ;;  %v1607_v17 = vor.u32 %v1976_v10, %v1604_v4  ;;  %v1535_v35 = vor.u32 %v1958_v24, %v1532_v26  ;;  %v2016_v10 = vld [vmem:[#allocation7 + $0x64] sm:$0xf]  ;;  %v2009_v26 = vld [vmem:[#allocation7 + $0x24] sm:$0xf0]  ;;  %v2006_v34 = vld [vmem:[#allocation7 + $0x14] sm:$0xf] }
  0x5e   :  { %857 = vmatpush.bf16.msra.mxu3 %v1631_v42  ;;  %v1652_v42 = vld [vmem:[#allocation4 + $0x298] sm:$0xf0] }
  0x5f   :  { %844 = vmatpush.bf16.msra.mxu1 %v1567_v48  ;;  %v1580_v48 = vld [vmem:[#allocation4 + $0x208] sm:$0xf0]  ;;  %v1655_v53 = vor.u32 %v1988_v41, %v1652_v42  ;;  %v1716_v41 = vld [vmem:[#allocation7] sm:$0xf]  ;;  %v2005_v42 = vld [vmem:[#allocation7 + $0x4] sm:$0xf0] }
  0x60   :  { %832 = vmatpush.bf16.msra.mxu0 %v1495_v52  ;;  %v1527_v52 = vor.u32 %v1956_v38, %v1524_v40  ;;  %v1583_v57 = vor.u32 %v1970_v47, %v1580_v48  ;;  %v1717_v45 = vor.u32 %v2005_v42, %v1716_v41  ;;  %v1718_v46 = vld [vmem:[#allocation7 + $0x8] sm:$0xf0] }
  0x61   :  { %870 = vmatpush.bf16.msrb.mxu2 %v1695_v49  ;;  %v2002_v49 = vld [vmem:[#allocation4 + $0x304] sm:$0xf] }
  0x62   :  { %858 = vmatpush.bf16.msra.mxu3 %v1623_v56  ;;  %v1516_v56 = vld [vmem:[#allocation4 + $0x188] sm:$0xf0]  ;;  %v1711_v61 = vor.u32 %v2002_v49, %v1708_v50  ;;  %v2282_v49 = vld [vmem:[#allocation6] sm:$0x3] }
  0x63   :  { %845 = vmatpush.bf16.msra.mxu1 %v1559_v62  ;;  %v1519_v62 = vor.u32 %v1954_v55, %v1516_v56  ;;  %v2034_v55 = vld [vmem:[#allocation7 + $0xf4] sm:$0xf] }
  0x64   :  { %833 = vmatpush.bf16.msra.mxu0 %v1487_v1  ;;  %v2019_v1 = vld [vmem:[#allocation7 + $0x74] sm:$0xf0] }
  0x65   :  { %871 = vmatpush.bf16.msrb.mxu2 %v1687_v63  ;;  %v1647_v63 = vor.u32 %v1986_v59, %v1644_v60  ;;  %v1773_v2 = vor.u32 %v2019_v1, %v1772_v0  ;;  %v1838_v59 = vld [vmem:[#allocation7 + $0xf8] sm:$0xf0]  ;;  %v215_v60 = vperm.slane %v2282_v49, 0  ;;  %v2033_v0 = vld [vmem:[#allocation7 + $0xe4] sm:$0xf0] }
  0x66   :  { %859 = vmatpush.bf16.msra.mxu3 %v1615_v7  ;;  %v1777_v7 = vor.u32 %v2018_v5, %v1774_v6  ;;  %v2032_v1 = vld [vmem:[#allocation7 + $0xe4] sm:$0xf]  ;;  %v1830_v6 = vld [vmem:[#allocation7 + $0xe8] sm:$0xf0] }
  0x67   :  { %846 = vmatpush.bf16.msra.mxu1 %v1551_v11  ;;  %v2014_v11 = vld [vmem:[#allocation7 + $0x54] sm:$0xf] }
  0x68   :  { %834 = vmatpush.bf16.msra.mxu0 %v1479_v13  ;;  %v2013_v13 = vld [vmem:[#allocation7 + $0x44] sm:$0xf0] }
  0x69   :  { %872 = vmatpush.bf16.msrb.mxu2 %v1679_v58  ;;  %v1758_v58 = vld [vmem:[#allocation7 + $0x58] sm:$0xf0] }
  0x6a   :  { %860 = vmatpush.bf16.msra.mxu3 %v1607_v17  ;;  %v1761_v14 = vor.u32 %v2014_v11, %v1758_v58  ;;  %v1749_v17 = vor.u32 %v2013_v13, %v1748_v12  ;;  %v1822_v11 = vld [vmem:[#allocation7 + $0xd8] sm:$0xf0]  ;;  %v1812_v12 = vld [vmem:[#allocation7 + $0xc0] sm:$0xf]  ;;  %v2029_v13 = vld [vmem:[#allocation7 + $0xc4] sm:$0xf0] }
  0x6b   :  { %847 = vmatpush.bf16.msra.mxu1 %v1543_v22  ;;  %v1742_v22 = vld [vmem:[#allocation7 + $0x38] sm:$0xf0]  ;;  %v1813_v16 = vor.u32 %v2029_v13, %v1812_v12 }
  0x6c   :  { %835 = vmatpush.bf16.msra.mxu0 %v1471_v25  ;;  %v1745_v24 = vor.u32 %v2010_v21, %v1742_v22  ;;  %v1732_v25 = vld [vmem:[#allocation7 + $0x20] sm:$0xf]  ;;  %v2043_v12 = vld [vmem:[#allocation9 + $0x38] sm:$0xff] }
  0x6d   :  { %873 = vmatpush.bf16.msrb.mxu2 %v1671_v23  ;;  %v1741_v23 = vor.u32 %v2011_v20, %v1740_v19  ;;  %v1733_v28 = vor.u32 %v2009_v26, %v1732_v25  ;;  %v2026_v25 = vld [vmem:[#allocation7 + $0xb4] sm:$0xf]  ;;  %v2051_v13 = vld [vmem:[#allocation9 + $0x78] sm:$0xff] }
  0x6e   :  { %861 = vmatpush.bf16.msra.mxu3 %v1599_v29  ;;  %v1734_v29 = vld [vmem:[#allocation7 + $0x28] sm:$0xf0] }
  0x6f   :  { %848 = vmatpush.bf16.msra.mxu1 %v1535_v35  ;;  %v1737_v31 = vor.u32 %v2008_v27, %v1734_v29  ;;  %v1725_v35 = vor.u32 %v2007_v33, %v1724_v32  ;;  %v1806_v27 = vld [vmem:[#allocation7 + $0xb8] sm:$0xf0]  ;;  %v1796_v32 = vld [vmem:[#allocation7 + $0xa0] sm:$0xf]  ;;  %v2025_v33 = vld [vmem:[#allocation7 + $0xa4] sm:$0xf0] }
  0x70   :  { %836 = vmatpush.bf16.msra.mxu0 %v1463_v39  ;;  %v1809_v29 = vor.u32 %v2026_v25, %v1806_v27 }
  0x71   :  { %874 = vmatpush.bf16.msrb.mxu2 %v1663_v36  ;;  %v1726_v36 = vld [vmem:[#allocation7 + $0x18] sm:$0xf0] }
  0x72   :  { %862 = vmatpush.bf16.msra.mxu3 %v1591_v44  ;;  %v1729_v39 = vor.u32 %v2006_v34, %v1726_v36  ;;  %v2004_v44 = vld [vmem:[#allocation7 + $0x4] sm:$0xf] }
  0x73   :  { %849 = vmatpush.bf16.msra.mxu1 %v1527_v52  ;;  %v1721_v47 = vor.u32 %v2004_v44, %v1718_v46  ;;  %v2024_v36 = vld [vmem:[#allocation7 + $0xa4] sm:$0xf]  ;;  %v2023_v46 = vld [vmem:[#allocation7 + $0x94] sm:$0xf0] }
  0x74   :  { %837 = vmatpush.bf16.msra.mxu0 %v1455_v54  ;;  %v2035_v54 = vld [vmem:[#allocation7 + $0xf4] sm:$0xf0] }
  0x75   :  { %875 = vmatpush.bf16.msrb.mxu2 %v1655_v53  ;;  %v1836_v53 = vld [vmem:[#allocation7 + $0xf0] sm:$0xf] }
  0x76   :  { %863 = vmatpush.bf16.msra.mxu3 %v1583_v57  ;;  %v1837_v57 = vor.u32 %v2035_v54, %v1836_v53  ;;  %v1780_v53 = vld [vmem:[#allocation7 + $0x80] sm:$0xf]  ;;  %v2021_v54 = vld [vmem:[#allocation7 + $0x84] sm:$0xf0] }
  0x77   :  { %850 = vmatpush.bf16.msra.mxu1 %v1519_v62  ;;  %838 = vmatmul.bf16.vlgmr.msra.gmra.mxu0 %v2252_v51  ;;  %v1765_v51 = vor.u32 %v2017_v9, %v1764_v8  ;;  %v1833_v8 = vor.u32 %v2032_v1, %v1830_v6 }
  0x78   :  { %889 = vmatpush.bf16.msrb.mxu0 %v1711_v61  ;;  %v1841_v61 = vor.u32 %v2034_v55, %v1838_v59  ;;  %v2020_v55 = vld [vmem:[#allocation7 + $0x84] sm:$0xf] }
  0x79   :  { %864 = vmatmul.bf16.vlgmr.msra.gmra.mxu3 %v2268_v30  ;;  %876 = vmatpush.bf16.msrb.mxu2 %v1647_v63  ;;  %v1766_v30 = vld [vmem:[#allocation7 + $0x68] sm:$0xf0]  ;;  %v1828_v63 = vld [vmem:[#allocation7 + $0xe0] sm:$0xf] }
  0x7a   :  { %851 = vmatmul.bf16.vlgmr.msra.gmra.mxu1 %v2256_v3  ;;  %v1769_v4 = vor.u32 %v2016_v10, %v1766_v30  ;;  %v1756_v3 = vld [vmem:[#allocation7 + $0x50] sm:$0xf]  ;;  %1110 = vmatpush.bf16.msrb.mxu3 %v1837_v57  ;;  %v1829_v5 = vor.u32 %v2033_v0, %v1828_v63  ;;  %v1782_v57 = vld [vmem:[#allocation7 + $0x88] sm:$0xf0] }
  0x7b   :  { %1097 = vmatpush.bf16.msrb.mxu1 %v1773_v2  ;;  %v1820_v30 = vld [vmem:[#allocation7 + $0xd0] sm:$0xf] }
  0x7c   :  { %877 = vmatmul.bf16.vlgmr.msrb.gmra.mxu2 %v2270_v37  ;;  %1123 = vmatpush.bf16.msra.mxu0 %v1777_v7  ;;  %v2015_v37 = vld [vmem:[#allocation7 + $0x54] sm:$0xf0] }
  0x7d   :  { %1136 = vmatpush.bf16.msra.mxu2 %v1841_v61 }
  0x7e   :  { %1111 = vmatpush.bf16.msrb.mxu3 %v1829_v5 }
  0x7f   :  { %1098 = vmatpush.bf16.msrb.mxu1 %v1765_v51 }
  0x80   :  { %1124 = vmatpush.bf16.msra.mxu0 %v1769_v4  ;;  %v2031_v4 = vld [vmem:[#allocation7 + $0xd4] sm:$0xf0] }
  0x81   :  { %1137 = vmatpush.bf16.msra.mxu2 %v1833_v8 }
  0x84   :  { %1125 = vmatpush.bf16.msra.mxu0 %v1761_v14  ;;  %v2028_v14 = vld [vmem:[#allocation7 + $0xc4] sm:$0xf] }
  0x87   :  { %1713 = vmatmul.msk.bf16.vlgmr.msrb.gmra.mxu0 %vm709_vm0, %v2264_v43  ;;  %v1757_v43 = vor.u32 %v2015_v37, %v1756_v3  ;;  %v2030_v3 = vld [vmem:[#allocation7 + $0xd4] sm:$0xf]  ;;  %v1821_v37 = vor.u32 %v2031_v4, %v1820_v30 }
  0x88   :  { %1126 = vmatpush.bf16.msra.mxu0 %v1753_v18 }
  0x89   :  { %1099 = vmatpush.bf16.msrb.mxu1 %v1757_v43  ;;  %v1825_v43 = vor.u32 %v2030_v3, %v1822_v11  ;;  %1112 = vmatpush.bf16.msrb.mxu3 %v1821_v37 }
  0x8b   :  { %1138 = vmatpush.bf16.msra.mxu2 %v1825_v43 }
  0x8c   :  { %1127 = vmatpush.bf16.msra.mxu0 %v1745_v24  ;;  %v2027_v24 = vld [vmem:[#allocation7 + $0xb4] sm:$0xf0] }
  0x8d   :  { %1100 = vmatpush.bf16.msrb.mxu1 %v1749_v17  ;;  %v1814_v17 = vld [vmem:[#allocation7 + $0xc8] sm:$0xf0]  ;;  %1113 = vmatpush.bf16.msrb.mxu3 %v1813_v16 }
  0x8e   :  { %v1817_v20 = vor.u32 %v2028_v14, %v1814_v17  ;;  %v2042_v14 = vld [vmem:[#allocation9 + $0x30] sm:$0xff]  ;;  %v2041_v16 = vld [vmem:[#allocation9 + $0x28] sm:$0xff] }
  0x8f   :  { %v2049_v17 = vld [vmem:[#allocation9 + $0x68] sm:$0xff] }
  0x90   :  { %1128 = vmatpush.bf16.msra.mxu0 %v1737_v31  ;;  %1139 = vmatpush.bf16.msra.mxu2 %v1817_v20  ;;  %v2039_v20 = vld [vmem:[#allocation9 + $0x18] sm:$0xff] }
  0x91   :  { %1101 = vmatpush.bf16.msrb.mxu1 %v1741_v23  ;;  %v1804_v23 = vld [vmem:[#allocation7 + $0xb0] sm:$0xf] }
  0x92   :  { %v1805_v26 = vor.u32 %v2027_v24, %v1804_v23  ;;  %v2046_v23 = vld [vmem:[#allocation9 + $0x50] sm:$0xff] }
  0x94   :  { %1129 = vmatpush.bf16.msra.mxu0 %v1729_v39  ;;  %1114 = vmatpush.bf16.msrb.mxu3 %v1805_v26 }
  0x95   :  { %1102 = vmatpush.bf16.msrb.mxu1 %v1733_v28  ;;  %1140 = vmatpush.bf16.msra.mxu2 %v1809_v29  ;;  %v2045_v29 = vld [vmem:[#allocation9 + $0x48] sm:$0xff] }
  0x98   :  { %1130 = vmatpush.bf16.msra.mxu0 %v1721_v47  ;;  %v2022_v47 = vld [vmem:[#allocation7 + $0x94] sm:$0xf] }
  0x99   :  { %1103 = vmatpush.bf16.msrb.mxu1 %v1725_v35  ;;  %v1797_v35 = vor.u32 %v2025_v33, %v1796_v32  ;;  %v2044_v32 = vld [vmem:[#allocation9 + $0x40] sm:$0xff]  ;;  %v931_v33 = vld [vmem:[%s2299_s4] sm:$0x3] }
  0x9b   :  { %1115 = vmatpush.bf16.msrb.mxu3 %v1797_v35  ;;  %v934_v35 = vperm.slane %v931_v33, 1 }
  0x9d   :  { %1104 = vmatpush.bf16.msrb.mxu1 %v1717_v45  ;;  %v1788_v45 = vld [vmem:[#allocation7 + $0x90] sm:$0xf] }
  0xa1   :  { %1285 = vmatpush.bf16.msra.mxu1 %v2043_v12 }
  0xa5   :  { %1286 = vmatpush.bf16.msra.mxu1 %v2042_v14 }
  0xa9   :  { %1287 = vmatpush.bf16.msra.mxu1 %v2041_v16 }
  0xb4   :  { %v722_v38 = vpop.f32.mrf.mxu0 }
  0xb5   :  { %v723_v2 = vadd.f32 %v722_v38, %v215_v60  ;;  %v1798_v38 = vld [vmem:[#allocation7 + $0xa8] sm:$0xf0]  ;;  %v1785_v60 = vor.u32 %v2020_v55, %v1782_v57 }
  0xb6   :  { %v1801_v41 = vor.u32 %v2024_v36, %v1798_v38 }
  0xb7   :  { %v735_v40 = vpop.f32.mrf.mxu1 }
  0xb8   :  { %v736_v9 = vadd.f32 %v735_v40, %v723_v2  ;;  %1141 = vmatpush.bf16.msra.mxu2 %v1801_v41 }
  0xbb   :  { %v748_v48 = vpop.f32.mrf.mxu2 }
  0xbc   :  { %v761_v50 = vpop.f32.mrf.mxu3  ;;  %v724_v52 = vpop.f32.mrf.mxu0  ;;  %v749_v51 = vadd.f32 %v748_v48, %v736_v9  ;;  %v1789_v48 = vor.u32 %v2023_v46, %v1788_v45 }
  0xbe   :  { %v762_v58 = vadd.f32 %v761_v50, %v749_v51  ;;  %v1790_v50 = vld [vmem:[#allocation7 + $0x98] sm:$0xf0]  ;;  %1116 = vmatpush.bf16.msrb.mxu3 %v1789_v48 }
  0xbf   :  { %v737_v56 = vpop.f32.mrf.mxu1  ;;  %v1793_v52 = vor.u32 %v2022_v47, %v1790_v50 }
  0xc0   :  { %v1781_v56 = vor.u32 %v2021_v54, %v1780_v53  ;;  %v2061_v53 = vld [vmem:[%s2301_s6] ss:$0 sm:$0xff] }
  0xc1   :  { %1142 = vmatpush.bf16.msra.mxu2 %v1793_v52 }
  0xc2   :  { %1117 = vmatpush.bf16.msrb.mxu3 %v1781_v56 }
  0xc3   :  { %v750_v62 = vpop.f32.mrf.mxu2 }
  0xc4   :  { %v763_v7 = vpop.f32.mrf.mxu3  ;;  %v216_v62 = vperm.slane %v2282_v49, 1 }
  0xc5   :  { %1143 = vmatpush.bf16.msra.mxu2 %v1785_v60 }
  0xc6   :  { %1298 = vmatpush.bf16.msra.mxu3 %v2051_v13 }
  0xcb   :  { %v800_v10 = vpop.f32.mrf.mxu2 }
  0xd3   :  { %v802_v19 = vpop.f32.mrf.mxu2 }
  0xd4   :  { %v774_v15 = vpop.f32.mrf.mxu0  ;;  %v2048_v19 = vld [vmem:[#allocation9 + $0x60] sm:$0xff] }
  0xd5   :  { %v775_v18 = vadd.f32 %v774_v15, %v762_v58  ;;  %v2050_v15 = vld [vmem:[#allocation9 + $0x70] sm:$0xff] }
  0xd6   :  { %1299 = vmatpush.bf16.msra.mxu3 %v2050_v15 }
  0xd7   :  { %v787_v21 = vpop.f32.mrf.mxu1 }
  0xd8   :  { %v788_v22 = vadd.f32 %v787_v21, %v775_v18  ;;  %v2040_v18 = vld [vmem:[#allocation9 + $0x20] sm:$0xff]  ;;  %v2047_v21 = vld [vmem:[#allocation9 + $0x58] sm:$0xff] }
  0xd9   :  { %1288 = vmatpush.bf16.msra.mxu1 %v2040_v18 }
  0xda   :  { %v801_v28 = vadd.f32 %v800_v10, %v788_v22  ;;  %1300 = vmatpush.bf16.msra.mxu3 %v2049_v17  ;;  %v2038_v22 = vld [vmem:[#allocation9 + $0x10] sm:$0xff] }
  0xdc   :  { %v895_v31 = vmax.f32 %v801_v28, 0.0  ;;  %v776_v34 = vpop.f32.mrf.mxu0  ;;  %v813_v42 = vpop.f32.mrf.mxu3  ;;  %v2037_v28 = vld [vmem:[#allocation9 + $0x8] sm:$0xff] }
  0xdd   :  { %v814_v63 = vadd.f32 %v813_v42, %v216_v62  ;;  %1289 = vmatpush.bf16.msra.mxu1 %v2039_v20  ;;  %v933_v34 = vperm.slane %v931_v33, 0 }
  0xde   :  { %v897_v39 = vpack.c.bf16 %v895_v31, %v895_v31  ;;  %1301 = vmatpush.bf16.msra.mxu3 %v2048_v19  ;;  %v2036_v31 = vld [vmem:[#allocation9] sm:$0xff] }
  0xdf   :  { %v826_v40 = vpop.f32.mrf.mxu2  ;;  %v789_v44 = vpop.f32.mrf.mxu1 }
  0xe0   :  { %1105 = vmatmul.bf16.vlgmr.msrb.gmra.mxu1 %v897_v39  ;;  %1131 = vmatmul.bf16.vlgmr.msra.gmra.mxu0 %v897_v39  ;;  %v827_v1 = vadd.f32 %v826_v40, %v814_v63 }
  0xe1   :  { %1290 = vmatpush.bf16.msra.mxu1 %v2038_v22 }
  0xe2   :  { %1302 = vmatpush.bf16.msra.mxu3 %v2047_v21 }
  0xe4   :  { %v815_v61 = vpop.f32.mrf.mxu3 }
  0xe5   :  { %1291 = vmatpush.bf16.msra.mxu1 %v2037_v28 }
  0xe6   :  { %1303 = vmatpush.bf16.msra.mxu3 %v2046_v23 }
  0xe7   :  { %v828_v59 = vpop.f32.mrf.mxu2 }
  0xe9   :  { %1292 = vmatpush.bf16.msra.mxu1 %v2036_v31 }
  0xea   :  { %1304 = vmatpush.bf16.msra.mxu3 %v2045_v29 }
  0xee   :  { %1305 = vmatpush.bf16.msra.mxu3 %v2044_v32 }
  0xf4   :  { %v839_v0 = vpop.f32.mrf.mxu0 }
  0xf5   :  { %v840_v5 = vadd.f32 %v839_v0, %v827_v1 }
  0xf7   :  { %v852_v2 = vpop.f32.mrf.mxu1 }
  0xf8   :  { %v853_v8 = vadd.f32 %v852_v2, %v840_v5 }
  0xfc   :  { %v865_v6 = vpop.f32.mrf.mxu3  ;;  %v841_v7 = vpop.f32.mrf.mxu0 }
  0xfd   :  { %v866_v10 = vadd.f32 %v865_v6, %v853_v8 }
  0xff   :  { %v878_v9 = vpop.f32.mrf.mxu2  ;;  %v854_v51 = vpop.f32.mrf.mxu1 }
 0x100   :  { %v879_v30 = vadd.f32 %v878_v9, %v866_v10 }
 0x104   :  { %v867_v4 = vpop.f32.mrf.mxu3  ;;  %v891_v3 = vpop.f32.mrf.mxu0 }
 0x105   :  { %v892_v37 = vadd.f32 %v891_v3, %v879_v30 }
 0x107   :  { %v880_v11 = vpop.f32.mrf.mxu2  ;;  %v896_v43 = vmax.f32 %v892_v37, 0.0 }
 0x109   :  { %v898_v58 = vpack.c.bf16 %v896_v43, %v896_v43 }
 0x10b   :  { %1118 = vmatmul.bf16.vlgmr.msrb.gmra.mxu3 %v898_v58  ;;  %1144 = vmatmul.bf16.vlgmr.msra.gmra.mxu2 %v898_v58 }
 0x10c   :  { %v893_v49 = vpop.f32.mrf.mxu0 }
 0x15d   :  { %v1106_v24 = vpop.f32.mrf.mxu1  ;;  %v1132_v25 = vpop.f32.mrf.mxu0 }
 0x15e   :  { %v1107_v36 = vadd.f32 %v1106_v24, %v933_v34  ;;  %v1133_v38 = vadd.f32 %v1132_v25, %v934_v35 }
 0x165   :  { %v1108_v26 = vpop.f32.mrf.mxu1  ;;  %v1134_v27 = vpop.f32.mrf.mxu0 }
 0x18e   :  { %v1119_v39 = vpop.f32.mrf.mxu3  ;;  %v1145_v40 = vpop.f32.mrf.mxu2 }
 0x18f   :  { %v1120_v41 = vadd.f32 %v1119_v39, %v1107_v36  ;;  %v1146_v42 = vadd.f32 %v1145_v40, %v1133_v38 }
 0x191   :  { %v1149_v44 = vmax.f32 %v1120_v41, 0.0  ;;  %v1150_v45 = vmax.f32 %v1146_v42, 0.0 }
 0x193   :  { %v1151_v46 = vpack.c.bf16 %v1149_v44, %v1149_v44  ;;  %v1152_v47 = vpack.c.bf16 %v1150_v45, %v1150_v45 }
 0x195   :  { %1293 = vmatmul.bf16.vlgmr.msra.gmra.mxu1 %v1151_v46  ;;  %1306 = vmatmul.bf16.vlgmr.msra.gmra.mxu3 %v1152_v47 }
 0x196   :  { %v1121_v48 = vpop.f32.mrf.mxu3  ;;  %v1147_v50 = vpop.f32.mrf.mxu2 }
 0x212   :  { %v1294_v52 = vpop.f32.mrf.mxu1 }
 0x213   :  { %v1295_v54 = vadd.f32 %v2061_v53, %v1294_v52 }
 0x218   :  { %v1307_v55 = vpop.f32.mrf.mxu3 }
 0x219   :  { %v1308_v56 = vadd.f32 %v1307_v55, %v1295_v54 }
 0x21a   :  { %v1296_v57 = vpop.f32.mrf.mxu1 }
 0x21b   :  { %v1311_v59 = vpack.c.bf16 %v1308_v56, %v1308_v56 }
 0x21d   :  { %1312 = vst [vmem:[%s2302_s7] sm:$0xf] %v1311_v59 }
 0x220   :  { %v1309_v60 = vpop.f32.mrf.mxu3 }
 0x221   :  { %1317 = vsyncpa [#allocation3], 1 }
 0x222   :  { %1318 = vsyncpa [#allocation5], 1 }
 0x223   :  { %1319 = vsyncpa [#allocation8], 1 }

</bundles_post_ra>
